<compile_context>
chip_gen: v7x
topology: tpu7x:2x2x1
jax: 0.10.0
libtpu: 0.0.40
codegen_flags: <defaults>
</compile_context>

<pallas_src>
import functools

import jax
import jax.numpy as jnp
from jax import lax
from jax.experimental import pallas as pl
from jax.experimental.pallas import tpu as pltpu

EPS = 1e-5


def _banded_conv_weights(w_hwio, w_spatial):
    """Fold a 3x3 HWIO conv weight into 3 row-banded matmul weights.

    Returns (3, W*Cin, W*Cout) such that for the dy-th matrix Wb:
        Wb[u*Cin + ci, x*Cout + co] = w[dy, dx, ci, co]   with  u = x + dx - 1,
    and taps with u outside [0, W) are dropped -> this implements the 'same'
    zero padding along the W axis purely through the weight band structure.
    """
    _, _, cin, cout = w_hwio.shape
    mats = []
    for dy in range(3):
        acc = jnp.zeros((w_spatial * cin, w_spatial * cout), jnp.float32)
        for dx in range(3):
            # shift[u, x] = 1  iff  u == x + dx - 1
            shift = jnp.eye(w_spatial, k=1 - dx, dtype=jnp.float32)
            acc = acc + jnp.kron(shift, w_hwio[dy, dx].astype(jnp.float32))
        mats.append(acc)
    return jnp.stack(mats)                       # (3, W*Cin, W*Cout)


def _row_shift_matrices(n, h):
    """0/1 per-image row-shift matrices (N*H, N*H) for the y-direction taps."""
    eye_n = jnp.eye(n, dtype=jnp.float32)
    # out[y] <- in[y-1]   (top row of each image gets zero, i.e. the y padding)
    sdown = jnp.kron(eye_n, jnp.eye(h, k=-1, dtype=jnp.float32))
    # out[y] <- in[y+1]   (bottom row of each image gets zero)
    sup = jnp.kron(eye_n, jnp.eye(h, k=1, dtype=jnp.float32))
    return sdown, sup


def double_conv_kernel(x_ref, w1_ref, b1_ref, w2_ref, b2_ref,
                       sdown_ref, sup_ref, gamma_ref, beta_ref,
                       gmat_ref, gtmat_ref, o_ref):
    # x_ref    : (N*H, W*Cin)       lane-dense input slab         (MXU dtype)
    # w1_ref   : (3, W*Cin, W*Cout) banded conv1 weights          (MXU dtype)
    # b1_ref   : (1, W*Cout)        conv1 bias tiled along lanes  (f32)
    # w2_ref   : (3, W*Cout, W*Cout) banded conv2 weights         (MXU dtype)
    # b2_ref   : (1, W*Cout)        conv2 bias tiled along lanes  (f32)
    # sdown/sup: (N*H, N*H)         0/1 per-image row-shift mats  (f32)
    # gamma/beta: (1, Cout)         BatchNorm affine params       (f32)
    # gmat_ref : (W*Cout, Cout)     0/1 lane -> channel collapse  (f32)
    # gtmat_ref: (Cout, W*Cout)     0/1 channel -> lane broadcast (f32)
    # o_ref    : (N*H, W*Cout)      lane-dense output             (f32)
    f32 = jnp.float32
    nh, wc = o_ref.shape
    cout = gamma_ref.shape[-1]

    sdown = sdown_ref[...]
    sup = sup_ref[...]

    def conv3x3(inp, w_ref):
        # x-direction taps + x padding are folded into the banded weights;
        # y-direction taps are 0/1 row-shift matmuls on the idle MXU, so no
        # strided slices / reshapes / relayouts are ever emitted.
        p0 = jnp.dot(inp, w_ref[0], preferred_element_type=f32)
        p1 = jnp.dot(inp, w_ref[1], preferred_element_type=f32)
        p2 = jnp.dot(inp, w_ref[2], preferred_element_type=f32)
        return (jnp.dot(sdown, p0, preferred_element_type=f32) + p1 +
                jnp.dot(sup, p2, preferred_element_type=f32))

    # ---- conv1 + bias (f32 accumulation) ----
    h1 = conv3x3(x_ref[...], w1_ref) + b1_ref[...]              # (N*H, W*Cout) f32

    # ---- conv2 + bias (cast back to MXU input dtype; accumulate in f32) ----
    acc2 = conv3x3(h1.astype(w2_ref.dtype), w2_ref) + b2_ref[...]

    # ---- BatchNorm2d: training-mode batch stats (biased variance), on MXU ----
    cnt = float(nh * (wc // cout))                              # N*H*W per channel
    ones_row = jnp.ones((1, nh), f32)
    col_sum = jnp.dot(ones_row, acc2, preferred_element_type=f32)        # (1, W*Cout)
    col_sq = jnp.dot(ones_row, acc2 * acc2, preferred_element_type=f32)  # (1, W*Cout)
    sum_ch = jnp.dot(col_sum, gmat_ref[...], preferred_element_type=f32)  # (1, Cout)
    sq_ch = jnp.dot(col_sq, gmat_ref[...], preferred_element_type=f32)    # (1, Cout)
    mean_ch = sum_ch / cnt
    var_ch = sq_ch / cnt - mean_ch * mean_ch
    scale_ch = gamma_ref[...] * lax.rsqrt(var_ch + EPS)
    shift_ch = beta_ref[...] - mean_ch * scale_ch
    scale_lane = jnp.dot(scale_ch, gtmat_ref[...], preferred_element_type=f32)
    shift_lane = jnp.dot(shift_ch, gtmat_ref[...], preferred_element_type=f32)

    # ---- affine + ReLU; single unmasked lane-dense store ----
    o_ref[...] = jnp.maximum(acc2 * scale_lane + shift_lane, 0.0)


@functools.partial(jax.jit, static_argnames=("mxu_dtype",))
def double_conv_block(x_nchw, w1_hwio, b1, w2_hwio, b2, gamma, beta,
                      mxu_dtype=jnp.bfloat16):
    """x_nchw: (N, Cin, H, W) f32 -> (N, Cout, H, W) f32."""
    n, cin, h, w = x_nchw.shape
    cout = w1_hwio.shape[-1]
    wc = w * cout                                               # 16 * 8 = 128 lanes

    # Lane-dense activation slab: rows = (n, y), lanes = (x, channel).
    x_slab = (jnp.transpose(x_nchw, (0, 2, 3, 1))
              .reshape(n * h, w * cin).astype(mxu_dtype))       # (N*H, W*Cin)

    w1b = _banded_conv_weights(w1_hwio, w).astype(mxu_dtype)    # (3, W*Cin, W*Cout)
    w2b = _banded_conv_weights(w2_hwio, w).astype(mxu_dtype)    # (3, W*Cout, W*Cout)
    sdown, sup = _row_shift_matrices(n, h)                      # (N*H, N*H) f32

    b1_lane = jnp.tile(b1.astype(jnp.float32).reshape(1, cout), (1, w))   # (1, W*Cout)
    b2_lane = jnp.tile(b2.astype(jnp.float32).reshape(1, cout), (1, w))

    # 0/1 matrices mapping lanes (x*Cout+co) <-> channels co for BN stats.
    gmat = jnp.tile(jnp.eye(cout, dtype=jnp.float32), (w, 1))   # (W*Cout, Cout)
    gtmat = gmat.T                                              # (Cout, W*Cout)

    out2d = pl.pallas_call(
        double_conv_kernel,
        out_shape=jax.ShapeDtypeStruct((n * h, wc), jnp.float32),
        in_specs=[pl.BlockSpec(memory_space=pltpu.MemorySpace.VMEM)] * 11,
        out_specs=pl.BlockSpec(memory_space=pltpu.MemorySpace.VMEM),
    )(x_slab, w1b, b1_lane, w2b, b2_lane, sdown, sup,
      gamma.astype(jnp.float32).reshape(1, cout),
      beta.astype(jnp.float32).reshape(1, cout), gmat, gtmat)

    return jnp.transpose(out2d.reshape(n, h, w, cout), (0, 3, 1, 2))      # NCHW


def _round_to(x, dtype):
    return x.astype(dtype).astype(jnp.float32)


def reference_forward(x_nchw, w1_hwio, b1, w2_hwio, b2, gamma, beta,
                      mxu_dtype=jnp.float32):
    """Pure-JAX reference with PyTorch semantics.

    mxu_dtype=f32 reproduces the f32 nn.Module exactly; mxu_dtype=bf16 mirrors
    the kernel's bf16-MXU-input / f32-accumulate arithmetic (for a tight check).
    """
    x = jnp.transpose(x_nchw, (0, 2, 3, 1))
    dn = ("NHWC", "HWIO", "NHWC")
    y = lax.conv_general_dilated(
        _round_to(x, mxu_dtype), _round_to(w1_hwio, mxu_dtype), (1, 1), "SAME",
        dimension_numbers=dn, precision=lax.Precision.HIGHEST) + b1
    y = lax.conv_general_dilated(
        _round_to(y, mxu_dtype), _round_to(w2_hwio, mxu_dtype), (1, 1), "SAME",
        dimension_numbers=dn, precision=lax.Precision.HIGHEST) + b2
    mean = y.mean(axis=(0, 1, 2))
    var = y.var(axis=(0, 1, 2))          # biased variance, like BN training mode
    y = (y - mean) * lax.rsqrt(var + EPS) * gamma + beta
    return jnp.transpose(jnp.maximum(y, 0.0), (0, 3, 1, 2))


if __name__ == "__main__":
    # Small shapes consistent with the module: N=2, Cin=4, Cout=8, 16x16 spatial.
    N, Cin, Cout, H, W = 2, 4, 8, 16, 16

    key = jax.random.PRNGKey(0)
    kx, k1, k2, k3, k4, k5, k6 = jax.random.split(key, 7)

    x = jax.random.normal(kx, (N, Cin, H, W), jnp.float32)
    w1 = jax.random.normal(k1, (3, 3, Cin, Cout), jnp.float32) * 0.2   # HWIO
    b1 = jax.random.normal(k2, (Cout,), jnp.float32) * 0.1
    w2 = jax.random.normal(k3, (3, 3, Cout, Cout), jnp.float32) * 0.2
    b2 = jax.random.normal(k4, (Cout,), jnp.float32) * 0.1
    gamma = 1.0 + 0.1 * jax.random.normal(k5, (Cout,), jnp.float32)
    beta = 0.1 * jax.random.normal(k6, (Cout,), jnp.float32)

    out = jax.block_until_ready(double_conv_block(x, w1, b1, w2, b2, gamma, beta))
    assert out.shape == (N, Cout, H, W), out.shape

    # Tight check against a reference that mirrors the kernel's bf16-MXU-input /
    # f32-accumulate arithmetic (same products; only summation order differs).
    ref_bf16 = jax.block_until_ready(
        reference_forward(x, w1, b1, w2, b2, gamma, beta, mxu_dtype=jnp.bfloat16))
    err_bf16 = float(jnp.max(jnp.abs(out - ref_bf16)))
    assert jnp.allclose(out, ref_bf16, rtol=1e-3, atol=1e-3), err_bf16

    # Sanity check against the exact f32 (PyTorch-semantics) reference; the only
    # deviation is the requested bf16 rounding of the MXU inputs (~1e-2 max).
    ref_f32 = jax.block_until_ready(
        reference_forward(x, w1, b1, w2, b2, gamma, beta, mxu_dtype=jnp.float32))
    err_f32 = float(jnp.max(jnp.abs(out - ref_f32)))
    assert jnp.allclose(out, ref_f32, rtol=3e-2, atol=3e-2), err_f32

    print("KERNEL_OK")
</pallas_src>

<mosaic_0001>
module attributes {stable_mosaic.version = 11 : i64} {
  func.func @double_conv_kernel(%arg0: memref<32x64xbf16, #tpu.memory_space<vmem>>, %arg1: memref<3x64x128xbf16, #tpu.memory_space<vmem>>, %arg2: memref<1x128xf32, #tpu.memory_space<vmem>>, %arg3: memref<3x128x128xbf16, #tpu.memory_space<vmem>>, %arg4: memref<1x128xf32, #tpu.memory_space<vmem>>, %arg5: memref<32x32xf32, #tpu.memory_space<vmem>>, %arg6: memref<32x32xf32, #tpu.memory_space<vmem>>, %arg7: memref<1x8xf32, #tpu.memory_space<vmem>>, %arg8: memref<1x8xf32, #tpu.memory_space<vmem>>, %arg9: memref<128x8xf32, #tpu.memory_space<vmem>>, %arg10: memref<8x128xf32, #tpu.memory_space<vmem>>, %arg11: memref<32x128xf32, #tpu.memory_space<vmem>>) attributes {dimension_semantics = [], scalar_prefetch = 0 : i64, scratch_operands = 0 : i64, tpu.core_type = #tpu.core_type<tc>} {
    %c0 = arith.constant 0 : index
    %c0_0 = arith.constant 0 : index
    %0 = vector.load %arg5[%c0, %c0_0] : memref<32x32xf32, #tpu.memory_space<vmem>>, vector<32x32xf32>
    %c0_1 = arith.constant 0 : index
    %c0_2 = arith.constant 0 : index
    %1 = vector.load %arg6[%c0_1, %c0_2] : memref<32x32xf32, #tpu.memory_space<vmem>>, vector<32x32xf32>
    %c0_3 = arith.constant 0 : index
    %c0_4 = arith.constant 0 : index
    %2 = vector.load %arg0[%c0_3, %c0_4] : memref<32x64xbf16, #tpu.memory_space<vmem>>, vector<32x64xbf16>
    %c0_5 = arith.constant 0 : index
    %c0_6 = arith.constant 0 : index
    %c0_7 = arith.constant 0 : index
    %3 = vector.load %arg1[%c0_5, %c0_6, %c0_7] : memref<3x64x128xbf16, #tpu.memory_space<vmem>>, vector<1x64x128xbf16>
    %4 = vector.shape_cast %3 : vector<1x64x128xbf16> to vector<64x128xbf16>
    %cst = arith.constant dense<0.000000e+00> : vector<32x128xf32>
    %5 = tpu.matmul %2, %4, %cst {dimension_numbers = #tpu.dot_dimension_numbers<[1], [0], [0], [1], [0, 0, 1, 1], [], []>} : vector<32x64xbf16>, vector<64x128xbf16>, vector<32x128xf32> -> vector<32x128xf32>
    %c1 = arith.constant 1 : index
    %c0_8 = arith.constant 0 : index
    %c0_9 = arith.constant 0 : index
    %6 = vector.load %arg1[%c1, %c0_8, %c0_9] : memref<3x64x128xbf16, #tpu.memory_space<vmem>>, vector<1x64x128xbf16>
    %7 = vector.shape_cast %6 : vector<1x64x128xbf16> to vector<64x128xbf16>
    %cst_10 = arith.constant dense<0.000000e+00> : vector<32x128xf32>
    %8 = tpu.matmul %2, %7, %cst_10 {dimension_numbers = #tpu.dot_dimension_numbers<[1], [0], [0], [1], [0, 0, 1, 1], [], []>} : vector<32x64xbf16>, vector<64x128xbf16>, vector<32x128xf32> -> vector<32x128xf32>
    %c2 = arith.constant 2 : index
    %c0_11 = arith.constant 0 : index
    %c0_12 = arith.constant 0 : index
    %9 = vector.load %arg1[%c2, %c0_11, %c0_12] : memref<3x64x128xbf16, #tpu.memory_space<vmem>>, vector<1x64x128xbf16>
    %10 = vector.shape_cast %9 : vector<1x64x128xbf16> to vector<64x128xbf16>
    %cst_13 = arith.constant dense<0.000000e+00> : vector<32x128xf32>
    %11 = tpu.matmul %2, %10, %cst_13 {dimension_numbers = #tpu.dot_dimension_numbers<[1], [0], [0], [1], [0, 0, 1, 1], [], []>} : vector<32x64xbf16>, vector<64x128xbf16>, vector<32x128xf32> -> vector<32x128xf32>
    %cst_14 = arith.constant dense<0.000000e+00> : vector<32x128xf32>
    %12 = tpu.matmul %0, %5, %cst_14 {dimension_numbers = #tpu.dot_dimension_numbers<[1], [0], [0], [1], [0, 0, 1, 1], [], []>} : vector<32x32xf32>, vector<32x128xf32>, vector<32x128xf32> -> vector<32x128xf32>
    %13 = arith.addf %12, %8 : vector<32x128xf32>
    %cst_15 = arith.constant dense<0.000000e+00> : vector<32x128xf32>
    %14 = tpu.matmul %1, %11, %cst_15 {dimension_numbers = #tpu.dot_dimension_numbers<[1], [0], [0], [1], [0, 0, 1, 1], [], []>} : vector<32x32xf32>, vector<32x128xf32>, vector<32x128xf32> -> vector<32x128xf32>
    %15 = arith.addf %13, %14 : vector<32x128xf32>
    %c0_16 = arith.constant 0 : index
    %c0_17 = arith.constant 0 : index
    %16 = vector.load %arg2[%c0_16, %c0_17] : memref<1x128xf32, #tpu.memory_space<vmem>>, vector<1x128xf32>
    %17 = vector.broadcast %16 : vector<1x128xf32> to vector<32x128xf32>
    %18 = arith.addf %15, %17 : vector<32x128xf32>
    %19 = arith.truncf %18 : vector<32x128xf32> to vector<32x128xbf16>
    %c0_18 = arith.constant 0 : index
    %c0_19 = arith.constant 0 : index
    %c0_20 = arith.constant 0 : index
    %20 = vector.load %arg3[%c0_18, %c0_19, %c0_20] : memref<3x128x128xbf16, #tpu.memory_space<vmem>>, vector<1x128x128xbf16>
    %21 = vector.shape_cast %20 : vector<1x128x128xbf16> to vector<128x128xbf16>
    %cst_21 = arith.constant dense<0.000000e+00> : vector<32x128xf32>
    %22 = tpu.matmul %19, %21, %cst_21 {dimension_numbers = #tpu.dot_dimension_numbers<[1], [0], [0], [1], [0, 0, 1, 1], [], []>} : vector<32x128xbf16>, vector<128x128xbf16>, vector<32x128xf32> -> vector<32x128xf32>
    %c1_22 = arith.constant 1 : index
    %c0_23 = arith.constant 0 : index
    %c0_24 = arith.constant 0 : index
    %23 = vector.load %arg3[%c1_22, %c0_23, %c0_24] : memref<3x128x128xbf16, #tpu.memory_space<vmem>>, vector<1x128x128xbf16>
    %24 = vector.shape_cast %23 : vector<1x128x128xbf16> to vector<128x128xbf16>
    %cst_25 = arith.constant dense<0.000000e+00> : vector<32x128xf32>
    %25 = tpu.matmul %19, %24, %cst_25 {dimension_numbers = #tpu.dot_dimension_numbers<[1], [0], [0], [1], [0, 0, 1, 1], [], []>} : vector<32x128xbf16>, vector<128x128xbf16>, vector<32x128xf32> -> vector<32x128xf32>
    %c2_26 = arith.constant 2 : index
    %c0_27 = arith.constant 0 : index
    %c0_28 = arith.constant 0 : index
    %26 = vector.load %arg3[%c2_26, %c0_27, %c0_28] : memref<3x128x128xbf16, #tpu.memory_space<vmem>>, vector<1x128x128xbf16>
    %27 = vector.shape_cast %26 : vector<1x128x128xbf16> to vector<128x128xbf16>
    %cst_29 = arith.constant dense<0.000000e+00> : vector<32x128xf32>
    %28 = tpu.matmul %19, %27, %cst_29 {dimension_numbers = #tpu.dot_dimension_numbers<[1], [0], [0], [1], [0, 0, 1, 1], [], []>} : vector<32x128xbf16>, vector<128x128xbf16>, vector<32x128xf32> -> vector<32x128xf32>
    %cst_30 = arith.constant dense<0.000000e+00> : vector<32x128xf32>
    %29 = tpu.matmul %0, %22, %cst_30 {dimension_numbers = #tpu.dot_dimension_numbers<[1], [0], [0], [1], [0, 0, 1, 1], [], []>} : vector<32x32xf32>, vector<32x128xf32>, vector<32x128xf32> -> vector<32x128xf32>
    %30 = arith.addf %29, %25 : vector<32x128xf32>
    %cst_31 = arith.constant dense<0.000000e+00> : vector<32x128xf32>
    %31 = tpu.matmul %1, %28, %cst_31 {dimension_numbers = #tpu.dot_dimension_numbers<[1], [0], [0], [1], [0, 0, 1, 1], [], []>} : vector<32x32xf32>, vector<32x128xf32>, vector<32x128xf32> -> vector<32x128xf32>
    %32 = arith.addf %30, %31 : vector<32x128xf32>
    %c0_32 = arith.constant 0 : index
    %c0_33 = arith.constant 0 : index
    %33 = vector.load %arg4[%c0_32, %c0_33] : memref<1x128xf32, #tpu.memory_space<vmem>>, vector<1x128xf32>
    %34 = vector.broadcast %33 : vector<1x128xf32> to vector<32x128xf32>
    %35 = arith.addf %32, %34 : vector<32x128xf32>
    %cst_34 = arith.constant 1.000000e+00 : f32
    %36 = vector.broadcast %cst_34 : f32 to vector<1x32xf32>
    %cst_35 = arith.constant dense<0.000000e+00> : vector<1x128xf32>
    %37 = tpu.matmul %36, %35, %cst_35 {dimension_numbers = #tpu.dot_dimension_numbers<[1], [0], [0], [1], [0, 0, 1, 1], [], []>} : vector<1x32xf32>, vector<32x128xf32>, vector<1x128xf32> -> vector<1x128xf32>
    %38 = arith.mulf %35, %35 : vector<32x128xf32>
    %cst_36 = arith.constant dense<0.000000e+00> : vector<1x128xf32>
    %39 = tpu.matmul %36, %38, %cst_36 {dimension_numbers = #tpu.dot_dimension_numbers<[1], [0], [0], [1], [0, 0, 1, 1], [], []>} : vector<1x32xf32>, vector<32x128xf32>, vector<1x128xf32> -> vector<1x128xf32>
    %c0_37 = arith.constant 0 : index
    %c0_38 = arith.constant 0 : index
    %40 = vector.load %arg9[%c0_37, %c0_38] : memref<128x8xf32, #tpu.memory_space<vmem>>, vector<128x8xf32>
    %cst_39 = arith.constant dense<0.000000e+00> : vector<1x8xf32>
    %41 = tpu.matmul %37, %40, %cst_39 {dimension_numbers = #tpu.dot_dimension_numbers<[1], [0], [0], [1], [0, 0, 1, 1], [], []>} : vector<1x128xf32>, vector<128x8xf32>, vector<1x8xf32> -> vector<1x8xf32>
    %c0_40 = arith.constant 0 : index
    %c0_41 = arith.constant 0 : index
    %42 = vector.load %arg9[%c0_40, %c0_41] : memref<128x8xf32, #tpu.memory_space<vmem>>, vector<128x8xf32>
    %cst_42 = arith.constant dense<0.000000e+00> : vector<1x8xf32>
    %43 = tpu.matmul %39, %42, %cst_42 {dimension_numbers = #tpu.dot_dimension_numbers<[1], [0], [0], [1], [0, 0, 1, 1], [], []>} : vector<1x128xf32>, vector<128x8xf32>, vector<1x8xf32> -> vector<1x8xf32>
    %cst_43 = arith.constant 5.120000e+02 : f32
    %44 = vector.broadcast %cst_43 : f32 to vector<1x8xf32>
    %45 = arith.divf %41, %44 : vector<1x8xf32>
    %cst_44 = arith.constant 5.120000e+02 : f32
    %46 = vector.broadcast %cst_44 : f32 to vector<1x8xf32>
    %47 = arith.divf %43, %46 : vector<1x8xf32>
    %48 = arith.mulf %45, %45 : vector<1x8xf32>
    %49 = arith.subf %47, %48 : vector<1x8xf32>
    %c0_45 = arith.constant 0 : index
    %c0_46 = arith.constant 0 : index
    %50 = vector.load %arg7[%c0_45, %c0_46] : memref<1x8xf32, #tpu.memory_space<vmem>>, vector<1x8xf32>
    %cst_47 = arith.constant 9.99999974E-6 : f32
    %51 = vector.broadcast %cst_47 : f32 to vector<1x8xf32>
    %52 = arith.addf %49, %51 : vector<1x8xf32>
    %53 = math.rsqrt %52 : vector<1x8xf32>
    %54 = arith.mulf %50, %53 : vector<1x8xf32>
    %c0_48 = arith.constant 0 : index
    %c0_49 = arith.constant 0 : index
    %55 = vector.load %arg8[%c0_48, %c0_49] : memref<1x8xf32, #tpu.memory_space<vmem>>, vector<1x8xf32>
    %56 = arith.mulf %45, %54 : vector<1x8xf32>
    %57 = arith.subf %55, %56 : vector<1x8xf32>
    %c0_50 = arith.constant 0 : index
    %c0_51 = arith.constant 0 : index
    %58 = vector.load %arg10[%c0_50, %c0_51] : memref<8x128xf32, #tpu.memory_space<vmem>>, vector<8x128xf32>
    %cst_52 = arith.constant dense<0.000000e+00> : vector<1x128xf32>
    %59 = tpu.matmul %54, %58, %cst_52 {dimension_numbers = #tpu.dot_dimension_numbers<[1], [0], [0], [1], [0, 0, 1, 1], [], []>} : vector<1x8xf32>, vector<8x128xf32>, vector<1x128xf32> -> vector<1x128xf32>
    %c0_53 = arith.constant 0 : index
    %c0_54 = arith.constant 0 : index
    %60 = vector.load %arg10[%c0_53, %c0_54] : memref<8x128xf32, #tpu.memory_space<vmem>>, vector<8x128xf32>
    %cst_55 = arith.constant dense<0.000000e+00> : vector<1x128xf32>
    %61 = tpu.matmul %57, %60, %cst_55 {dimension_numbers = #tpu.dot_dimension_numbers<[1], [0], [0], [1], [0, 0, 1, 1], [], []>} : vector<1x8xf32>, vector<8x128xf32>, vector<1x128xf32> -> vector<1x128xf32>
    %62 = vector.broadcast %59 : vector<1x128xf32> to vector<32x128xf32>
    %63 = arith.mulf %35, %62 : vector<32x128xf32>
    %64 = vector.broadcast %61 : vector<1x128xf32> to vector<32x128xf32>
    %65 = arith.addf %63, %64 : vector<32x128xf32>
    %cst_56 = arith.constant 0.000000e+00 : f32
    %66 = vector.broadcast %cst_56 : f32 to vector<32x128xf32>
    %67 = arith.maximumf %65, %66 : vector<32x128xf32>
    %c0_57 = arith.constant 0 : index
    %c0_58 = arith.constant 0 : index
    %68 = vector.load %arg11[%c0_57, %c0_58] : memref<32x128xf32, #tpu.memory_space<vmem>>, vector<32x128xf32>
    tpu.vector_store %arg11[%c0_57, %c0_58], %67 {strides = array<i32>} : memref<32x128xf32, #tpu.memory_space<vmem>>, vector<32x128xf32>,
    return
  }
}

</mosaic_0001>

<bundles_post_ra>
// kernel: tile.25
= control target key start
LH: loop header
LB: loop body
LE: loop exit
PB: predicated region body
PF: predicated region fallthrough
CT: control target
= control target key end

     0   :  { %vm6_vm0 = vcmask 1043458   ;;  %vm10_vm1 = vcmask 1045508   ;;  %vm14_vm2 = vcmask 1047558   ;;  %s19_s6 = smov 3  ;;  %s22_s7 = smov 12  ;;  %vm16_vm3 = vcmask 64512   ;;  %s736_s0 = inlined_call_operand.vmem [shape: f32[16,8,8], index: 0, kind: input, shape index: {}]   ;;  %s737_s1 = inlined_call_operand.vmem [shape: f32[128,8], index: 1, kind: output, shape index: {}]  }
   0x1   :  { %v348_v0 = vld [vmem:[%s736_s0 + $0xf] ss:$16 sm:%s19_s6]   ;;  %s27_s12 = smov 48  ;;  %s32_s13 = smov 192  ;;  %vm38_vm4 = vcmask 1048512   ;;  %vm60_vm5 = vcmask 982912  }
   0x2   :  { %v349_v1 = vld [vmem:[%s736_s0 + $0xf] ss:$16 sm:%s22_s7]   ;;  %s63_s18 = smov 3  ;;  %s66_s21 = smov 12  ;;  %vm82_vm6 = vcmask 917312   ;;  %vm104_vm7 = vcmask 851712  }
   0x3   :  { %v25_v2 = vsel %vm6_vm0, %v349_v1, %v348_v0  ;;  %v350_v3 = vld [vmem:[%s736_s0 + $0xf] ss:$16 sm:%s27_s12]   ;;  %v356_v6 = vld [vmem:[%s736_s0 + $0xd] ss:$16 sm:%s63_s18]   ;;  %s71_s22 = smov 48  ;;  %s76_s27 = smov 192 }
   0x4   :  { %v351_v4 = vld [vmem:[%s736_s0 + $0xf] ss:$16 sm:%s32_s13]   ;;  %v30_v5 = vsel %vm10_vm1, %v350_v3, %v25_v2  ;;  %v357_v8 = vld [vmem:[%s736_s0 + $0xd] ss:$16 sm:%s66_s21]   ;;  %s423_s28 = smov 120   ;;  %s41_s2 = smov 3 }
   0x5   :  { %v35_v7 = vsel %vm14_vm2, %v351_v4, %v30_v5  ;;  %v358_v9 = vld [vmem:[%s736_s0 + $0xd] ss:$16 sm:%s71_s22]   ;;  %v69_v10 = vsel %vm6_vm0, %v357_v8, %v356_v6  ;;  %s44_s3 = smov 12  ;;  %v352_v13 = vld [vmem:[%s736_s0 + $0xe] ss:$16 sm:%s41_s2]   ;;  %s49_s8 = smov 48 }
   0x6   :  { %36 = vrot.lane.b32.xlu0 %v35_v7, %s423_s28  ;;  %v359_v11 = vld [vmem:[%s736_s0 + $0xd] ss:$16 sm:%s76_s27]   ;;  %v74_v12 = vsel %vm10_vm1, %v358_v9, %v69_v10  ;;  %s54_s9 = smov 192  ;;  %s85_s14 = smov 3  ;;  %vm126_vm8 = vcmask 786112   ;;  %vm148_vm9 = vcmask 720512  }
   0x7   :  { %v353_v14 = vld [vmem:[%s736_s0 + $0xe] ss:$16 sm:%s44_s3]   ;;  %v79_v15 = vsel %vm14_vm2, %v359_v11, %v74_v12  ;;  %s424_s15 = smov 104   ;;  %v360_v20 = vld [vmem:[%s736_s0 + $0xc] ss:$16 sm:%s85_s14]   ;;  %s88_s18 = smov 12 }
   0x8   :  { %v47_v16 = vsel %vm6_vm0, %v353_v14, %v352_v13  ;;  %v354_v17 = vld [vmem:[%s736_s0 + $0xe] ss:$16 sm:%s49_s8]   ;;  %80 = vrot.lane.b32.xlu1 %v79_v15, %s424_s15  ;;  %s93_s19 = smov 48  ;;  %s98_s24 = smov 192  ;;  %vm170_vm10 = vcmask 654912   ;;  %vm192_vm11 = vcmask 589312  }
   0x9   :  { %v355_v18 = vld [vmem:[%s736_s0 + $0xe] ss:$16 sm:%s54_s9]   ;;  %v52_v19 = vsel %vm10_vm1, %v354_v17, %v47_v16  ;;  %v361_v22 = vld [vmem:[%s736_s0 + $0xc] ss:$16 sm:%s88_s18]   ;;  %s425_s25 = smov 112   ;;  %s107_s28 = smov 3 }
   0xa   :  { %v57_v21 = vsel %vm14_vm2, %v355_v18, %v52_v19  ;;  %v362_v23 = vld [vmem:[%s736_s0 + $0xc] ss:$16 sm:%s93_s19]   ;;  %v91_v24 = vsel %vm6_vm0, %v361_v22, %v360_v20  ;;  %s110_s29 = smov 12  ;;  %v364_v27 = vld [vmem:[%s736_s0 + $0xb] ss:$16 sm:%s107_s28]   ;;  %s115_s5 = smov 48 }
   0xb   :  { %58 = vrot.lane.b32.xlu0 %v57_v21, %s425_s25  ;;  %v363_v25 = vld [vmem:[%s736_s0 + $0xc] ss:$16 sm:%s98_s24]   ;;  %v96_v26 = vsel %vm10_vm1, %v362_v23, %v91_v24  ;;  %s120_s6 = smov 192  ;;  %s129_s11 = smov 3  ;;  %vm214_vm12 = vcmask 523712   ;;  %vm236_vm13 = vcmask 458112  }
   0xc   :  { %v365_v28 = vld [vmem:[%s736_s0 + $0xb] ss:$16 sm:%s110_s29]   ;;  %v101_v29 = vsel %vm14_vm2, %v363_v25, %v96_v26  ;;  %s426_s12 = smov 96   ;;  %v368_v34 = vld [vmem:[%s736_s0 + $0xa] ss:$16 sm:%s129_s11]   ;;  %s132_s15 = smov 12 }
   0xd   :  { %v113_v30 = vsel %vm6_vm0, %v365_v28, %v364_v27  ;;  %v366_v31 = vld [vmem:[%s736_s0 + $0xb] ss:$16 sm:%s115_s5]   ;;  %102 = vrot.lane.b32.xlu1 %v101_v29, %s426_s12  ;;  %s137_s16 = smov 48  ;;  %s142_s21 = smov 192  ;;  %vm258_vm14 = vcmask 392512   ;;  %vm280_vm15 = vcmask 326912  }
   0xe   :  { %v367_v32 = vld [vmem:[%s736_s0 + $0xb] ss:$16 sm:%s120_s6]   ;;  %v118_v33 = vsel %vm10_vm1, %v366_v31, %v113_v30  ;;  %v369_v36 = vld [vmem:[%s736_s0 + $0xa] ss:$16 sm:%s132_s15]   ;;  %s427_s22 = smov 88   ;;  %s151_s25 = smov 3 }
   0xf   :  { %v123_v35 = vsel %vm14_vm2, %v367_v32, %v118_v33  ;;  %v370_v37 = vld [vmem:[%s736_s0 + $0xa] ss:$16 sm:%s137_s16]   ;;  %v135_v38 = vsel %vm6_vm0, %v369_v36, %v368_v34  ;;  %s154_s26 = smov 12  ;;  %v372_v41 = vld [vmem:[%s736_s0 + $0x9] ss:$16 sm:%s151_s25]   ;;  %s159_s2 = smov 48 }
  0x10   :  { %124 = vrot.lane.b32.xlu0 %v123_v35, %s427_s22  ;;  %v371_v39 = vld [vmem:[%s736_s0 + $0xa] ss:$16 sm:%s142_s21]   ;;  %v140_v40 = vsel %vm10_vm1, %v370_v37, %v135_v38  ;;  %s164_s3 = smov 192  ;;  %s173_s8 = smov 3 }
  0x11   :  { %v373_v42 = vld [vmem:[%s736_s0 + $0x9] ss:$16 sm:%s154_s26]   ;;  %v145_v43 = vsel %vm14_vm2, %v371_v39, %v140_v40  ;;  %s428_s9 = smov 80   ;;  %v376_v48 = vld [vmem:[%s736_s0 + $0x8] ss:$16 sm:%s173_s8]   ;;  %s176_s12 = smov 12 }
  0x12   :  { %v157_v44 = vsel %vm6_vm0, %v373_v42, %v372_v41  ;;  %v374_v45 = vld [vmem:[%s736_s0 + $0x9] ss:$16 sm:%s159_s2]   ;;  %146 = vrot.lane.b32.xlu1 %v145_v43, %s428_s9  ;;  %s181_s13 = smov 48  ;;  %s186_s18 = smov 192 }
  0x13   :  { %v375_v46 = vld [vmem:[%s736_s0 + $0x9] ss:$16 sm:%s164_s3]   ;;  %v162_v47 = vsel %vm10_vm1, %v374_v45, %v157_v44  ;;  %v377_v50 = vld [vmem:[%s736_s0 + $0x8] ss:$16 sm:%s176_s12]   ;;  %s429_s19 = smov 72   ;;  %s195_s22 = smov 3 }
  0x14   :  { %v167_v49 = vsel %vm14_vm2, %v375_v46, %v162_v47  ;;  %v378_v51 = vld [vmem:[%s736_s0 + $0x8] ss:$16 sm:%s181_s13]   ;;  %v179_v52 = vsel %vm6_vm0, %v377_v50, %v376_v48  ;;  %s198_s23 = smov 12  ;;  %v380_v55 = vld [vmem:[%s736_s0 + $0x7] ss:$16 sm:%s195_s22]   ;;  %s203_s28 = smov 48 }
  0x15   :  { %168 = vrot.lane.b32.xlu0 %v167_v49, %s429_s19  ;;  %v379_v53 = vld [vmem:[%s736_s0 + $0x8] ss:$16 sm:%s186_s18]   ;;  %v184_v54 = vsel %vm10_vm1, %v378_v51, %v179_v52  ;;  %s208_s29 = smov 192  ;;  %s217_s5 = smov 3 }
  0x16   :  { %v381_v56 = vld [vmem:[%s736_s0 + $0x7] ss:$16 sm:%s198_s23]   ;;  %v189_v57 = vsel %vm14_vm2, %v379_v53, %v184_v54  ;;  %s430_s6 = smov 64   ;;  %v384_v62 = vld [vmem:[%s736_s0 + $0x6] ss:$16 sm:%s217_s5]   ;;  %s220_s9 = smov 12 }
  0x17   :  { %v201_v58 = vsel %vm6_vm0, %v381_v56, %v380_v55  ;;  %v382_v59 = vld [vmem:[%s736_s0 + $0x7] ss:$16 sm:%s203_s28]   ;;  %190 = vrot.lane.b32.xlu1 %v189_v57, %s430_s6  ;;  %s225_s10 = smov 48  ;;  %s230_s15 = smov 192 }
  0x18   :  { %v383_v60 = vld [vmem:[%s736_s0 + $0x7] ss:$16 sm:%s208_s29]   ;;  %v206_v61 = vsel %vm10_vm1, %v382_v59, %v201_v58  ;;  %v385_v0 = vld [vmem:[%s736_s0 + $0x6] ss:$16 sm:%s220_s9]   ;;  %s431_s16 = smov 56   ;;  %s239_s19 = smov 3 }
  0x19   :  { %v211_v63 = vsel %vm14_vm2, %v383_v60, %v206_v61  ;;  %v386_v1 = vld [vmem:[%s736_s0 + $0x6] ss:$16 sm:%s225_s10]   ;;  %v223_v2 = vsel %vm6_vm0, %v385_v0, %v384_v62  ;;  %s242_s20 = smov 12  ;;  %v388_v5 = vld [vmem:[%s736_s0 + $0x5] ss:$16 sm:%s239_s19]   ;;  %s247_s25 = smov 48 }
  0x1a   :  { %212 = vrot.lane.b32.xlu0 %v211_v63, %s431_s16  ;;  %v387_v3 = vld [vmem:[%s736_s0 + $0x6] ss:$16 sm:%s230_s15]   ;;  %v228_v4 = vsel %vm10_vm1, %v386_v1, %v223_v2  ;;  %s252_s26 = smov 192  ;;  %s261_s2 = smov 3 }
  0x1b   :  { %v389_v6 = vld [vmem:[%s736_s0 + $0x5] ss:$16 sm:%s242_s20]   ;;  %v233_v7 = vsel %vm14_vm2, %v387_v3, %v228_v4  ;;  %s432_s3 = smov 48   ;;  %v392_v12 = vld [vmem:[%s736_s0 + $0x4] ss:$16 sm:%s261_s2]   ;;  %s264_s6 = smov 12 }
  0x1c   :  { %v245_v8 = vsel %vm6_vm0, %v389_v6, %v388_v5  ;;  %v390_v9 = vld [vmem:[%s736_s0 + $0x5] ss:$16 sm:%s247_s25]   ;;  %234 = vrot.lane.b32.xlu1 %v233_v7, %s432_s3  ;;  %s269_s7 = smov 48  ;;  %s274_s12 = smov 192 }
  0x1d   :  { %v391_v10 = vld [vmem:[%s736_s0 + $0x5] ss:$16 sm:%s252_s26]   ;;  %v250_v11 = vsel %vm10_vm1, %v390_v9, %v245_v8  ;;  %v393_v14 = vld [vmem:[%s736_s0 + $0x4] ss:$16 sm:%s264_s6]   ;;  %s433_s13 = smov 40   ;;  %s283_s16 = smov 3 }
  0x1e   :  { %v255_v13 = vsel %vm14_vm2, %v391_v10, %v250_v11  ;;  %v394_v15 = vld [vmem:[%s736_s0 + $0x4] ss:$16 sm:%s269_s7]   ;;  %v267_v16 = vsel %vm6_vm0, %v393_v14, %v392_v12  ;;  %s286_s17 = smov 12  ;;  %v396_v19 = vld [vmem:[%s736_s0 + $0x3] ss:$16 sm:%s283_s16]   ;;  %s291_s22 = smov 48 }
  0x1f   :  { %256 = vrot.lane.b32.xlu0 %v255_v13, %s433_s13  ;;  %v395_v17 = vld [vmem:[%s736_s0 + $0x4] ss:$16 sm:%s274_s12]   ;;  %v272_v18 = vsel %vm10_vm1, %v394_v15, %v267_v16  ;;  %s296_s23 = smov 192  ;;  %s305_s28 = smov 3 }
  0x20   :  { %v397_v20 = vld [vmem:[%s736_s0 + $0x3] ss:$16 sm:%s286_s17]   ;;  %v277_v21 = vsel %vm14_vm2, %v395_v17, %v272_v18  ;;  %s434_s29 = smov 32   ;;  %v400_v26 = vld [vmem:[%s736_s0 + $0x2] ss:$16 sm:%s305_s28]   ;;  %s308_s3 = smov 12 }
  0x21   :  { %v289_v22 = vsel %vm6_vm0, %v397_v20, %v396_v19  ;;  %v398_v23 = vld [vmem:[%s736_s0 + $0x3] ss:$16 sm:%s291_s22]   ;;  %278 = vrot.lane.b32.xlu1 %v277_v21, %s434_s29  ;;  %s313_s4 = smov 48  ;;  %s318_s9 = smov 192 }
  0x22   :  { %v399_v24 = vld [vmem:[%s736_s0 + $0x3] ss:$16 sm:%s296_s23]   ;;  %v294_v25 = vsel %vm10_vm1, %v398_v23, %v289_v22  ;;  %v401_v28 = vld [vmem:[%s736_s0 + $0x2] ss:$16 sm:%s308_s3]   ;;  %s435_s10 = smov 24   ;;  %s327_s13 = smov 3 }
  0x23   :  { %v299_v27 = vsel %vm14_vm2, %v399_v24, %v294_v25  ;;  %v402_v29 = vld [vmem:[%s736_s0 + $0x2] ss:$16 sm:%s313_s4]   ;;  %v311_v30 = vsel %vm6_vm0, %v401_v28, %v400_v26  ;;  %s330_s14 = smov 12  ;;  %v404_v33 = vld [vmem:[%s736_s0 + $0x1] ss:$16 sm:%s327_s13]   ;;  %s335_s19 = smov 48 }
  0x24   :  { %300 = vrot.lane.b32.xlu0 %v299_v27, %s435_s10  ;;  %v403_v31 = vld [vmem:[%s736_s0 + $0x2] ss:$16 sm:%s318_s9]   ;;  %v316_v32 = vsel %vm10_vm1, %v402_v29, %v311_v30  ;;  %s340_s20 = smov 192  ;;  %s2_s25 = smov 3 }
  0x25   :  { %v405_v34 = vld [vmem:[%s736_s0 + $0x1] ss:$16 sm:%s330_s14]   ;;  %v321_v35 = vsel %vm14_vm2, %v403_v31, %v316_v32  ;;  %s436_s26 = smov 16   ;;  %s4_s27 = smov 12  ;;  %v3_v40 = vld [vmem:[%s736_s0] ss:$16 sm:%s2_s25]  }
  0x26   :  { %v333_v36 = vsel %vm6_vm0, %v405_v34, %v404_v33  ;;  %v406_v37 = vld [vmem:[%s736_s0 + $0x1] ss:$16 sm:%s335_s19]   ;;  %322 = vrot.lane.b32.xlu1 %v321_v35, %s436_s26  ;;  %s8_s28 = smov 48  ;;  %s12_s2 = smov 192 }
  0x27   :  { %v407_v38 = vld [vmem:[%s736_s0 + $0x1] ss:$16 sm:%s340_s20]   ;;  %v338_v39 = vsel %vm10_vm1, %v406_v37, %v333_v36  ;;  %v5_v42 = vld [vmem:[%s736_s0] ss:$16 sm:%s4_s27]   ;;  %s437_s7 = smov 8  }
  0x28   :  { %v343_v41 = vsel %vm14_vm2, %v407_v38, %v338_v39  ;;  %v9_v43 = vld [vmem:[%s736_s0] ss:$16 sm:%s8_s28]   ;;  %v7_v44 = vsel %vm6_vm0, %v5_v42, %v3_v40  ;;  %vm302_vm0 = vcmask 261312  }
  0x29   :  { %344 = vrot.lane.b32.xlu0 %v343_v41, %s437_s7  ;;  %v13_v45 = vld [vmem:[%s736_s0] ss:$16 sm:%s12_s2]   ;;  %v11_v46 = vsel %vm10_vm1, %v9_v43, %v7_v44  ;;  %vm324_vm1 = vcmask 195712  }
  0x2a   :  { %v15_v47 = vsel %vm14_vm2, %v13_v45, %v11_v46  ;;  %vm346_vm2 = vcmask 130112  }
  0x2b   :  { %17 = vst.msk [vmem:[%s737_s1] sm:$0xff] %vm16_vm3, %v15_v47  }
  0x78   :  { %v37_v48 = vpop.permute.xlu0 %36  }
  0x79   :  { %39 = vst.msk [vmem:[%s737_s1] sm:$0xff] %vm38_vm4, %v37_v48  }
  0x7a   :  { %v81_v49 = vpop.permute.xlu1 %80  }
  0x7d   :  { %v59_v50 = vpop.permute.xlu0 %58  }
  0x7e   :  { %61 = vst.msk [vmem:[%s737_s1] sm:$0xff] %vm60_vm5, %v59_v50  }
  0x7f   :  { %83 = vst.msk [vmem:[%s737_s1] sm:$0xff] %vm82_vm6, %v81_v49   ;;  %v103_v51 = vpop.permute.xlu1 %102  }
  0x80   :  { %105 = vst.msk [vmem:[%s737_s1] sm:$0xff] %vm104_vm7, %v103_v51  }
  0x82   :  { %v125_v52 = vpop.permute.xlu0 %124  }
  0x83   :  { %127 = vst.msk [vmem:[%s737_s1] sm:$0xff] %vm126_vm8, %v125_v52  }
  0x84   :  { %v147_v53 = vpop.permute.xlu1 %146  }
  0x85   :  { %149 = vst.msk [vmem:[%s737_s1] sm:$0xff] %vm148_vm9, %v147_v53  }
  0x87   :  { %v169_v54 = vpop.permute.xlu0 %168  }
  0x88   :  { %171 = vst.msk [vmem:[%s737_s1] sm:$0xff] %vm170_vm10, %v169_v54  }
  0x89   :  { %v191_v55 = vpop.permute.xlu1 %190  }
  0x8a   :  { %193 = vst.msk [vmem:[%s737_s1] sm:$0xff] %vm192_vm11, %v191_v55  }
  0x8c   :  { %v213_v56 = vpop.permute.xlu0 %212  }
  0x8d   :  { %215 = vst.msk [vmem:[%s737_s1] sm:$0xff] %vm214_vm12, %v213_v56  }
  0x8e   :  { %v235_v57 = vpop.permute.xlu1 %234  }
  0x8f   :  { %237 = vst.msk [vmem:[%s737_s1] sm:$0xff] %vm236_vm13, %v235_v57  }
  0x91   :  { %v257_v58 = vpop.permute.xlu0 %256  }
  0x92   :  { %259 = vst.msk [vmem:[%s737_s1] sm:$0xff] %vm258_vm14, %v257_v58  }
  0x93   :  { %v279_v59 = vpop.permute.xlu1 %278  }
  0x94   :  { %281 = vst.msk [vmem:[%s737_s1] sm:$0xff] %vm280_vm15, %v279_v59  }
  0x96   :  { %v301_v60 = vpop.permute.xlu0 %300  }
  0x97   :  { %303 = vst.msk [vmem:[%s737_s1] sm:$0xff] %vm302_vm0, %v301_v60  }
  0x98   :  { %v323_v61 = vpop.permute.xlu1 %322  }
  0x99   :  { %325 = vst.msk [vmem:[%s737_s1] sm:$0xff] %vm324_vm1, %v323_v61  }
  0x9b   :  { %v345_v62 = vpop.permute.xlu0 %344  }
  0x9c   :  { %347 = vst.msk [vmem:[%s737_s1] sm:$0xff] %vm346_vm2, %v345_v62  }

// kernel: double_conv_block.1
= control target key start
LH: loop header
LB: loop body
LE: loop exit
PB: predicated region body
PF: predicated region fallthrough
CT: control target
= control target key end

     0   :  { %vm93_vm0 = vcmask 523264   ;;  %vm313_vm1 = vcmask 261120   ;;  %vm2175_vm2 = vmmov 0   ;;  %vm1367_vm3 = vcmask 64512   ;;  %s2605_s1 = inlined_call_operand.vmem [shape: bf16[3,64,128], index: 1, kind: input, shape index: {}]   ;;  %s2606_s0 = inlined_call_operand.vmem [shape: bf16[32,64], index: 0, kind: input, shape index: {}]   ;;  %s2607_s5 = inlined_call_operand.vmem [shape: f32[32,32], index: 5, kind: input, shape index: {}]   ;;  %s2608_s3 = inlined_call_operand.vmem [shape: bf16[3,128,128], index: 3, kind: input, shape index: {}]   ;;  %s2609_s6 = inlined_call_operand.vmem [shape: f32[32,32], index: 6, kind: input, shape index: {}]   ;;  %s2610_s2 = inlined_call_operand.vmem [shape: f32[1,128], index: 2, kind: input, shape index: {}]   ;;  %s2611_s9 = inlined_call_operand.vmem [shape: f32[128,8], index: 9, kind: input, shape index: {}]   ;;  %s2612_s4 = inlined_call_operand.vmem [shape: f32[1,128], index: 4, kind: input, shape index: {}]   ;;  %s2613_s10 = inlined_call_operand.vmem [shape: f32[8,128], index: 10, kind: input, shape index: {}]   ;;  %s2614_s7 = inlined_call_operand.vmem [shape: f32[1,8], index: 7, kind: input, shape index: {}]   ;;  %s2615_s8 = inlined_call_operand.vmem [shape: f32[1,8], index: 8, kind: input, shape index: {}]   ;;  %s2616_s11 = inlined_call_operand.vmem [shape: f32[32,128], index: 11, kind: output, shape index: {}]  }
   0x1   :  { %v2134_v0 = vld [vmem:[%s2605_s1] sm:$0xff]   ;;  %v2135_v1 = vld [vmem:[%s2605_s1 + $0x8] sm:$0xff]   ;;  %v2136_v2 = vld [vmem:[%s2605_s1 + $0x10] sm:$0xff]  }
   0x2   :  { %1784 = vmatprep.subr.bf16.mxu0 %v2134_v0  ;;  %v2138_v3 = vld [vmem:[%s2606_s0] sm:$0xff]   ;;  %v2137_v4 = vld [vmem:[%s2605_s1 + $0x18] sm:$0xff]   ;;  %v2145_v6 = vld [vmem:[%s2605_s1 + $0x28] sm:$0xff]  }
   0x3   :  { %1785 = vmatpush3.bf16.msra.mxu0 %v2134_v0  ;;  %1792 = vmatprep.mubr.msk.bf16.mxu0 %vm93_vm0, %v2138_v3  ;;  %v2144_v5 = vld [vmem:[%s2605_s1 + $0x20] sm:$0xff]   ;;  %v2139_v8 = vld [vmem:[%s2606_s0 + $0x8] sm:$0xff]   ;;  %v2146_v9 = vld [vmem:[%s2605_s1 + $0x30] sm:$0xff]  }
   0x4   :  { %1786 = vmatprep.subr.bf16.mxu0 %v2135_v1  ;;  %1804 = vmatprep.mubr.msk.bf16.mxu1 %vm93_vm0, %v2138_v3  ;;  %v2140_v7 = vld [vmem:[%s2605_s1 + $0x40] sm:$0xff]   ;;  %v2141_v10 = vld [vmem:[%s2605_s1 + $0x48] sm:$0xff]   ;;  %v2142_v11 = vld [vmem:[%s2605_s1 + $0x50] sm:$0xff]  }
   0x5   :  { %1796 = vmatprep.subr.bf16.mxu1 %v2144_v5  ;;  %v2143_v12 = vld [vmem:[%s2605_s1 + $0x58] sm:$0xff]   ;;  %v2289_v14 = vld [vmem:[%s2607_s5] sm:$0xff]  ;;  %v2150_v16 = vld [vmem:[%s2608_s3 + $0x8] sm:$0xff]  }
   0x6   :  { %1797 = vmatpush3.bf16.msra.mxu1 %v2144_v5  ;;  %v2147_v13 = vld [vmem:[%s2605_s1 + $0x38] sm:$0xff]   ;;  %v2148_v15 = vld [vmem:[%s2608_s3] sm:$0xff]   ;;  %v2302_v23 = vld [vmem:[%s2607_s5 + $0x8] sm:$0xff] }
   0x7   :  { %1787 = vmatpush3.bf16.msra.mxu0 %v2135_v1  ;;  %1798 = vmatprep.subr.bf16.mxu1 %v2145_v6  ;;  %v2307_v24 = vld [vmem:[%s2607_s5 + $0x10] sm:$0xff]  ;;  %v2316_v25 = vld [vmem:[%s2607_s5 + $0x18] sm:$0xff]  ;;  %v2321_v27 = vld [vmem:[%s2609_s6] sm:$0xff] }
   0x8   :  { %1788 = vmatprep.subr.bf16.mxu0 %v2136_v2  ;;  %v2149_v33 = vld [vmem:[%s2608_s3 + $0x40] sm:$0xff]   ;;  %v2333_v34 = vld [vmem:[%s2609_s6 + $0x8] sm:$0xff]  ;;  %v2338_v35 = vld [vmem:[%s2609_s6 + $0x10] sm:$0xff] }
   0x9   :  { %v2347_v36 = vld [vmem:[%s2609_s6 + $0x18] sm:$0xff]  ;;  %v2151_v41 = vld [vmem:[%s2608_s3 + $0x48] sm:$0xff]   ;;  %v2152_v42 = vld [vmem:[%s2608_s3 + $0x10] sm:$0xff]  }
   0xa   :  { %1799 = vmatpush3.bf16.msra.mxu1 %v2145_v6  ;;  %v2153_v43 = vld [vmem:[%s2608_s3 + $0x50] sm:$0xff]   ;;  %v2154_v44 = vld [vmem:[%s2608_s3 + $0x18] sm:$0xff]   ;;  %v2156_v46 = vld [vmem:[%s2608_s3 + $0x20] sm:$0xff]  }
   0xb   :  { %1789 = vmatpush3.bf16.msra.mxu0 %v2136_v2  ;;  %1800 = vmatprep.subr.bf16.mxu1 %v2146_v9  ;;  %v2155_v45 = vld [vmem:[%s2608_s3 + $0x58] sm:$0xff]   ;;  %v2157_v47 = vld [vmem:[%s2608_s3 + $0x60] sm:$0xff]   ;;  %v2158_v48 = vld [vmem:[%s2608_s3 + $0x28] sm:$0xff]  }
   0xc   :  { %1790 = vmatprep.subr.bf16.mxu0 %v2137_v4  ;;  %v2159_v49 = vld [vmem:[%s2608_s3 + $0x68] sm:$0xff]   ;;  %v2160_v50 = vld [vmem:[%s2608_s3 + $0x30] sm:$0xff]   ;;  %v2162_v52 = vld [vmem:[%s2608_s3 + $0x38] sm:$0xff]  }
   0xd   :  { %v2161_v51 = vld [vmem:[%s2608_s3 + $0x70] sm:$0xff]   ;;  %v2163_v53 = vld [vmem:[%s2608_s3 + $0x78] sm:$0xff]   ;;  %v2164_v54 = vld [vmem:[%s2608_s3 + $0x80] sm:$0xff]  }
   0xe   :  { %1801 = vmatpush3.bf16.msra.mxu1 %v2146_v9  ;;  %v1586_v0 = vld [vmem:[%s2610_s2] ss:$0 sm:$0xff] }
   0xf   :  { %1791 = vmatpush3.bf16.msra.mxu0 %v2137_v4  ;;  %1802 = vmatprep.subr.bf16.mxu1 %v2147_v13 }
  0x10   :  { %1808 = vmatprep.subr.bf16.mxu0 %v2140_v7 }
  0x12   :  { %1793 = vmatmul.mubr.msk.bf16.vlgmr.msra.gmra.mrb[0].mxu0 %vm93_vm0, %v2139_v8  ;;  %1803 = vmatpush3.bf16.msra.mxu1 %v2147_v13 }
  0x13   :  { %1809 = vmatpush3.bf16.msra.mxu0 %v2140_v7  ;;  %1816 = vmatprep.mubr.msk.bf16.mxu0 %vm93_vm0, %v2138_v3 }
  0x14   :  { %1810 = vmatprep.subr.bf16.mxu0 %v2141_v10 }
  0x15   :  { %1805 = vmatmul.mubr.msk.bf16.vlgmr.msra.gmra.mrb[0].mxu1 %vm93_vm0, %v2139_v8 }
  0x16   :  { %1828 = vmatprep.mubr.msk.f32.mxu1 %vm313_vm1, %v2289_v14 }
  0x17   :  { %1811 = vmatpush3.bf16.msra.mxu0 %v2141_v10 }
  0x18   :  { %1812 = vmatprep.subr.bf16.mxu0 %v2142_v11 }
  0x1b   :  { %1813 = vmatpush3.bf16.msra.mxu0 %v2142_v11 }
  0x1c   :  { %1814 = vmatprep.subr.bf16.mxu0 %v2143_v12 }
  0x1f   :  { %1815 = vmatpush3.bf16.msra.mxu0 %v2143_v12 }
  0x20   :  { %1848 = vmatprep.subr.bf16.mxu0 %v2148_v15 }
  0x22   :  { %1817 = vmatmul.mubr.msk.bf16.vlgmr.msra.gmra.mrb[4].mxu0 %vm93_vm0, %v2139_v8 }
  0x23   :  { %1849 = vmatpush3.bf16.msra.mxu0 %v2148_v15  ;;  %v2165_v15 = vld [vmem:[%s2608_s3 + $0x88] sm:$0xff]  }
  0x24   :  { %1850 = vmatprep.subr.bf16.mxu0 %v2150_v16 }
  0x27   :  { %1851 = vmatpush3.bf16.msra.mxu0 %v2150_v16  ;;  %v2166_v16 = vld [vmem:[%s2608_s3 + $0x90] sm:$0xff]  }
  0x28   :  { %1852 = vmatprep.subr.bf16.mxu0 %v2152_v42 }
  0x2b   :  { %1853 = vmatpush3.bf16.msra.mxu0 %v2152_v42 }
  0x2c   :  { %1854 = vmatprep.subr.bf16.mxu0 %v2154_v44 }
  0x2f   :  { %1855 = vmatpush3.bf16.msra.mxu0 %v2154_v44 }
  0x30   :  { %1856 = vmatprep.subr.bf16.mxu0 %v2156_v46 }
  0x33   :  { %1857 = vmatpush3.bf16.msra.mxu0 %v2156_v46  ;;  %v1203_v46 = vld [vmem:[%s2611_s9 + $0x28] sm:$0xff] }
  0x34   :  { %1858 = vmatprep.subr.bf16.mxu0 %v2158_v48 }
  0x37   :  { %1859 = vmatpush3.bf16.msra.mxu0 %v2158_v48  ;;  %v1204_v48 = vld [vmem:[%s2611_s9 + $0x30] sm:$0xff] }
  0x38   :  { %1860 = vmatprep.subr.bf16.mxu0 %v2160_v50 }
  0x3b   :  { %1861 = vmatpush3.bf16.msra.mxu0 %v2160_v50 }
  0x3c   :  { %1862 = vmatprep.subr.bf16.mxu0 %v2162_v52 }
  0x3f   :  { %1863 = vmatpush3.bf16.msra.mxu0 %v2162_v52  ;;  %v1207_v52 = vld [vmem:[%s2611_s9 + $0x48] sm:$0xff] }
  0x40   :  { %1888 = vmatprep.subr.bf16.mxu0 %v2164_v54 }
  0xe5   :  { %v1794_v17 = vpop.f32.mrb[0].mxu0 }
  0xe6   :  { %v134_v18 = vpop.f32.mrb[1].mxu0 }
  0xe7   :  { %v1795_v19 = vpop.f32.mrb[2].mxu0 }
  0xe8   :  { %v2042_v20 = vpack.c.bf16 %v1795_v19, %v1794_v17  ;;  %v137_v21 = vpop.f32.mrb[3].mxu0  ;;  %v1806_v37 = vpop.f32.mrb[0].mxu1  ;;  %v2167_v17 = vld [vmem:[%s2608_s3 + $0x98] sm:$0xff]   ;;  %v2169_v19 = vld [vmem:[%s2608_s3 + $0xa8] sm:$0xff]  }
  0xe9   :  { %v2038_v22 = vpack.c.bf16 %v137_v21, %v134_v18  ;;  %v216_v38 = vpop.f32.mrb[1].mxu1  ;;  %v2168_v18 = vld [vmem:[%s2608_s3 + $0xa0] sm:$0xff]  }
  0xea   :  { %v1807_v39 = vpop.f32.mrb[2].mxu1 }
  0xeb   :  { %2039 = vmatprep.subr.bf16.mxu1 %v2038_v22  ;;  %v219_v40 = vpop.f32.mrb[3].mxu1 }
  0xec   :  { %2041 = vmatpush3.bf16.msra.mxu1 %v2038_v22 }
  0xed   :  { %2043 = vmatprep.subr.bf16.mxu1 %v2042_v20 }
  0xf0   :  { %2045 = vmatpush3.bf16.msra.mxu1 %v2042_v20  ;;  %v2171_v20 = vld [vmem:[%s2608_s3 + $0xb8] sm:$0xff]  }
  0xf3   :  { %1829 = vmatmul.mubr.msk.f32.vlgmr.msra.gmra.mrb[4].mxu1 %vm313_vm1, %v2302_v23 }
  0xf4   :  { %1831 = vmatprep.mubr.msk.f32.mxu1 %vm313_vm1, %v2307_v24 }
  0xf5   :  { %v1818_v26 = vpop.f32.mrb[4].mxu0 }
  0xf6   :  { %v298_v28 = vpop.f32.mrb[5].mxu0 }
  0xf7   :  { %v1819_v29 = vpop.f32.mrb[6].mxu0  ;;  %1832 = vmatmul.mubr.msk.f32.gmra.mrb[6].mxu1 %vm313_vm1, %v2316_v25 }
  0xf8   :  { %v2050_v30 = vpack.c.bf16 %v1819_v29, %v1818_v26  ;;  %v301_v31 = vpop.f32.mrb[7].mxu0  ;;  %1842 = vmatprep.mubr.msk.f32.mxu1 %vm313_vm1, %v2321_v27 }
  0xf9   :  { %v2046_v32 = vpack.c.bf16 %v301_v31, %v298_v28 }
  0xfb   :  { %2047 = vmatprep.subr.bf16.mxu1 %v2046_v32 }
  0xfc   :  { %2049 = vmatpush3.bf16.msra.mxu1 %v2046_v32 }
  0xfd   :  { %2051 = vmatprep.subr.bf16.mxu1 %v2050_v30 }
 0x100   :  { %2053 = vmatpush3.bf16.msra.mxu1 %v2050_v30 }
 0x101   :  { %1868 = vmatprep.subr.bf16.mxu1 %v2149_v33 }
 0x103   :  { %1843 = vmatmul.mubr.msk.f32.vlgmr.msra.gmra.mrb[8].mxu1 %vm313_vm1, %v2333_v34 }
 0x104   :  { %1845 = vmatprep.mubr.msk.f32.mxu1 %vm313_vm1, %v2338_v35  ;;  %1869 = vmatpush3.bf16.msra.mxu1 %v2149_v33 }
 0x105   :  { %1870 = vmatprep.subr.bf16.mxu1 %v2151_v41 }
 0x107   :  { %1846 = vmatmul.mubr.msk.f32.gmra.mrb[10].mxu1 %vm313_vm1, %v2347_v36 }
 0x108   :  { %1871 = vmatpush3.bf16.msra.mxu1 %v2151_v41 }
 0x109   :  { %1872 = vmatprep.subr.bf16.mxu1 %v2153_v43 }
 0x10c   :  { %1873 = vmatpush3.bf16.msra.mxu1 %v2153_v43 }
 0x10d   :  { %1874 = vmatprep.subr.bf16.mxu1 %v2155_v45 }
 0x110   :  { %1875 = vmatpush3.bf16.msra.mxu1 %v2155_v45  ;;  %v1202_v45 = vld [vmem:[%s2611_s9 + $0x20] sm:$0xff] }
 0x111   :  { %1876 = vmatprep.subr.bf16.mxu1 %v2157_v47 }
 0x114   :  { %1877 = vmatpush3.bf16.msra.mxu1 %v2157_v47  ;;  %v2472_v47 = vpack.c.bf16 %v1203_v46, %v1202_v45  ;;  %v1363_v46 = vld [vmem:[%s2615_s8] sm:$0x1] }
 0x115   :  { %1878 = vmatprep.subr.bf16.mxu1 %v2159_v49 }
 0x118   :  { %1879 = vmatpush3.bf16.msra.mxu1 %v2159_v49  ;;  %v1205_v49 = vld [vmem:[%s2611_s9 + $0x38] sm:$0xff] }
 0x119   :  { %1880 = vmatprep.subr.bf16.mxu1 %v2161_v51  ;;  %v2482_v50 = vpack.c.bf16 %v1205_v49, %v1204_v48  ;;  %v1514_v49 = vlaneseq }
 0x11c   :  { %1881 = vmatpush3.bf16.msra.mxu1 %v2161_v51  ;;  %v1206_v51 = vld [vmem:[%s2611_s9 + $0x40] sm:$0xff] }
 0x11d   :  { %1882 = vmatprep.subr.bf16.mxu1 %v2163_v53 }
 0x120   :  { %1883 = vmatpush3.bf16.msra.mxu1 %v2163_v53  ;;  %v2492_v53 = vpack.c.bf16 %v1207_v52, %v1206_v51 }
 0x1c6   :  { %v1830_v55 = vpop.f32.mrb[4].mxu1 }
 0x1c7   :  { %v398_v56 = vadd.f32 %v1830_v55, %v219_v40  ;;  %v392_v57 = vpop.f32.mrb[5].mxu1  ;;  %v1209_v55 = vld [vmem:[%s2611_s9 + $0x58] sm:$0xff] }
 0x1c8   :  { %v393_v58 = vadd.f32 %v392_v57, %v216_v38  ;;  %v1210_v57 = vld [vmem:[%s2611_s9 + $0x60] sm:$0xff] }
 0x1ca   :  { %v1833_v59 = vpop.f32.mrb[6].mxu1 }
 0x1cb   :  { %v408_v60 = vadd.f32 %v1833_v59, %v1807_v39  ;;  %v402_v61 = vpop.f32.mrb[7].mxu1 }
 0x1cc   :  { %v403_v62 = vadd.f32 %v1806_v37, %v402_v61  ;;  %v1213_v61 = vld [vmem:[%s2611_s9 + $0x78] sm:$0xff] }
 0x1d6   :  { %v1844_v63 = vpop.f32.mrb[8].mxu1 }
 0x1d7   :  { %v509_v1 = vadd.f32 %v1844_v63, %v398_v56  ;;  %v489_v2 = vpop.f32.mrb[9].mxu1 }
 0x1d8   :  { %v508_v3 = vadd.f32 %v489_v2, %v393_v58  ;;  %v1211_v58 = vld [vmem:[%s2611_s9 + $0x68] sm:$0xff] }
 0x1d9   :  { %v520_v4 = vadd.f32 %v1586_v0, %v509_v1  ;;  %v2512_v59 = vpack.c.bf16 %v1211_v58, %v1210_v57 }
 0x1da   :  { %v519_v5 = vadd.f32 %v1586_v0, %v508_v3  ;;  %v1847_v6 = vpop.f32.mrb[10].mxu1 }
 0x1db   :  { %v511_v7 = vadd.f32 %v1847_v6, %v408_v60  ;;  %v499_v8 = vpop.f32.mrb[11].mxu1  ;;  %v1212_v60 = vld [vmem:[%s2611_s9 + $0x70] sm:$0xff] }
 0x1dc   :  { %v510_v9 = vadd.f32 %v499_v8, %v403_v62  ;;  %v523_v10 = vpack.c.bf16 %v520_v4, %v519_v5  ;;  %v2104_v62 = vpack.c.bf16 %v1213_v61, %v1212_v60  ;;  %v1651_v8 = vld [vmem:[%s2612_s4] ss:$0 sm:$0xff] }
 0x1dd   :  { %v522_v11 = vadd.f32 %v1586_v0, %v511_v7 }
 0x1de   :  { %v521_v12 = vadd.f32 %v1586_v0, %v510_v9  ;;  %1864 = vmatprep.mubr.bf16.mxu0 %v523_v10  ;;  %1884 = vmatprep.mubr.bf16.mxu1 %v523_v10 }
 0x1e0   :  { %v524_v13 = vpack.c.bf16 %v522_v11, %v521_v12 }
 0x1e2   :  { %1865 = vmatmul.mubr.bf16.vlgmr.msra.gmra.mrb[8].mxu0 %v524_v13  ;;  %1885 = vmatmul.mubr.bf16.vlgmr.msra.gmra.mrb[12].mxu1 %v524_v13 }
 0x1e3   :  { %1889 = vmatpush3.bf16.msra.mxu0 %v2164_v54  ;;  %1904 = vmatprep.mubr.bf16.mxu0 %v523_v10  ;;  %v1208_v54 = vld [vmem:[%s2611_s9 + $0x50] sm:$0xff] }
 0x1e4   :  { %1890 = vmatprep.subr.bf16.mxu0 %v2165_v15  ;;  %1916 = vmatprep.mubr.msk.f32.mxu1 %vm313_vm1, %v2289_v14  ;;  %v2170_v14 = vld [vmem:[%s2608_s3 + $0xb0] sm:$0xff]   ;;  %v2502_v56 = vpack.c.bf16 %v1209_v55, %v1208_v54 }
 0x1e7   :  { %1891 = vmatpush3.bf16.msra.mxu0 %v2165_v15 }
 0x1e8   :  { %1892 = vmatprep.subr.bf16.mxu0 %v2166_v16 }
 0x1eb   :  { %1893 = vmatpush3.bf16.msra.mxu0 %v2166_v16 }
 0x1ec   :  { %1894 = vmatprep.subr.bf16.mxu0 %v2167_v17 }
 0x1ef   :  { %1895 = vmatpush3.bf16.msra.mxu0 %v2167_v17 }
 0x1f0   :  { %1896 = vmatprep.subr.bf16.mxu0 %v2168_v18 }
 0x1f3   :  { %1897 = vmatpush3.bf16.msra.mxu0 %v2168_v18 }
 0x1f4   :  { %1898 = vmatprep.subr.bf16.mxu0 %v2169_v19 }
 0x1f7   :  { %1899 = vmatpush3.bf16.msra.mxu0 %v2169_v19 }
 0x1f8   :  { %1900 = vmatprep.subr.bf16.mxu0 %v2170_v14 }
 0x1fb   :  { %1901 = vmatpush3.bf16.msra.mxu0 %v2170_v14 }
 0x1fc   :  { %1902 = vmatprep.subr.bf16.mxu0 %v2171_v20 }
 0x1ff   :  { %1903 = vmatpush3.bf16.msra.mxu0 %v2171_v20 }
 0x202   :  { %1905 = vmatmul.mubr.bf16.vlgmr.msra.gmra.mrb[12].mxu0 %v524_v13 }
 0x2b5   :  { %v1866_v21 = vpop.f32.mrb[8].mxu0  ;;  %v2419_v22 = vpop.f32.mrb[12].mxu1 }
 0x2b6   :  { %v623_v26 = vpop.f32.mrb[9].mxu0  ;;  %v2421_v28 = vpop.f32.mrb[13].mxu1 }
 0x2b7   :  { %v1867_v29 = vpop.f32.mrb[10].mxu0  ;;  %v2423_v30 = vpop.f32.mrb[14].mxu1 }
 0x2b8   :  { %v2058_v31 = vpack.c.bf16 %v1867_v29, %v1866_v21  ;;  %v626_v32 = vpop.f32.mrb[11].mxu0  ;;  %v2425_v33 = vpop.f32.mrb[15].mxu1 }
 0x2b9   :  { %v2054_v37 = vpack.c.bf16 %v626_v32, %v623_v26 }
 0x2bb   :  { %2055 = vmatprep.subr.bf16.mxu1 %v2054_v37 }
 0x2bc   :  { %2057 = vmatpush3.bf16.msra.mxu1 %v2054_v37 }
 0x2bd   :  { %2059 = vmatprep.subr.bf16.mxu1 %v2058_v31 }
 0x2c0   :  { %2061 = vmatpush3.bf16.msra.mxu1 %v2058_v31  ;;  %v2177_v31 = vmov 1.0  }
 0x2c3   :  { %1917 = vmatmul.mubr.msk.f32.vlgmr.msra.gmra.mrb[16].mxu1 %vm313_vm1, %v2302_v23  ;;  %v2174_v23 = vmov 0.0|0.0  }
 0x2c4   :  { %1919 = vmatprep.mubr.msk.f32.mxu1 %vm313_vm1, %v2307_v24  ;;  %2082 = vmatprep.subr.bf16.mxu0 %v2174_v23  ;;  %v2176_v24 = vmov 0.0  }
 0x2c5   :  { %1990 = vmatprep.mubr.msk.f32.mxu0 %vm2175_vm2, %v2176_v24 }
 0x2c7   :  { %1920 = vmatmul.mubr.msk.f32.gmra.mrb[18].mxu1 %vm313_vm1, %v2316_v25  ;;  %v1198_v25 = vld [vmem:[%s2611_s9] sm:$0xff] }
 0x2c8   :  { %1930 = vmatprep.mubr.msk.f32.mxu1 %vm313_vm1, %v2321_v27  ;;  %v1199_v27 = vld [vmem:[%s2611_s9 + $0x8] sm:$0xff] }
 0x2d5   :  { %v1906_v38 = vpop.f32.mrb[12].mxu0 }
 0x2d6   :  { %v851_v39 = vpop.f32.mrb[13].mxu0 }
 0x2d7   :  { %v1907_v40 = vpop.f32.mrb[14].mxu0 }
 0x2d8   :  { %v2066_v41 = vpack.c.bf16 %v1907_v40, %v1906_v38  ;;  %v854_v42 = vpop.f32.mrb[15].mxu0  ;;  %v1366_v40 = vld [vmem:[%s2613_s10] sm:$0xff] }
 0x2d9   :  { %v2062_v43 = vpack.c.bf16 %v854_v42, %v851_v39 }
 0x2db   :  { %2063 = vmatprep.subr.bf16.mxu1 %v2062_v43 }
 0x2dc   :  { %2065 = vmatpush3.bf16.msra.mxu1 %v2062_v43 }
 0x2dd   :  { %2067 = vmatprep.subr.bf16.mxu1 %v2066_v41 }
 0x2e0   :  { %2069 = vmatpush3.bf16.msra.mxu1 %v2066_v41 }
 0x2e1   :  { %2070 = vmatprep.subr.bf16.mxu1 %v2174_v23 }
 0x2e3   :  { %1931 = vmatmul.mubr.msk.f32.vlgmr.msra.gmra.mrb[20].mxu1 %vm313_vm1, %v2333_v34  ;;  %v1200_v34 = vld [vmem:[%s2611_s9 + $0x10] sm:$0xff] }
 0x2e4   :  { %1933 = vmatprep.mubr.msk.f32.mxu1 %vm313_vm1, %v2338_v35  ;;  %v2456_v35 = vpack.c.bf16 %v1199_v27, %v1198_v25 }
 0x2e6   :  { %2084 = vmatpush3.bf16.msra.mxu0 %v2456_v35 }
 0x2e7   :  { %1934 = vmatmul.mubr.msk.f32.gmra.mrb[22].mxu1 %vm313_vm1, %v2347_v36  ;;  %v1201_v36 = vld [vmem:[%s2611_s9 + $0x18] sm:$0xff]  ;;  %2085 = vmatprep.subr.bf16.mxu0 %v2174_v23 }
 0x2e8   :  { %1944 = vmatprep.mubr.msk.f32.mxu1 %vm2175_vm2, %v2176_v24  ;;  %v2462_v44 = vpack.c.bf16 %v1201_v36, %v1200_v34 }
 0x2ea   :  { %2087 = vmatpush3.bf16.msra.mxu0 %v2462_v44 }
 0x2eb   :  { %2088 = vmatprep.subr.bf16.mxu0 %v2174_v23 }
 0x2ee   :  { %2090 = vmatpush3.bf16.msra.mxu0 %v2472_v47 }
 0x2ef   :  { %2091 = vmatprep.subr.bf16.mxu0 %v2174_v23 }
 0x2f2   :  { %2093 = vmatpush3.bf16.msra.mxu0 %v2482_v50 }
 0x2f3   :  { %2094 = vmatprep.subr.bf16.mxu0 %v2174_v23 }
 0x2f6   :  { %2096 = vmatpush3.bf16.msra.mxu0 %v2492_v53 }
 0x2f7   :  { %2097 = vmatprep.subr.bf16.mxu0 %v2174_v23 }
 0x2fa   :  { %2099 = vmatpush3.bf16.msra.mxu0 %v2502_v56 }
 0x2fb   :  { %2100 = vmatprep.subr.bf16.mxu0 %v2174_v23 }
 0x2fe   :  { %2102 = vmatpush3.bf16.msra.mxu0 %v2512_v59 }
 0x2ff   :  { %2103 = vmatprep.subr.bf16.mxu0 %v2174_v23 }
 0x302   :  { %2105 = vmatpush3.bf16.msra.mxu0 %v2104_v62 }
 0x303   :  { %2028 = vmatprep.subr.mxu0 %v2176_v24 }
 0x396   :  { %v1918_v63 = vpop.f32.mrb[16].mxu1 }
 0x397   :  { %v938_v0 = vadd.f32 %v1918_v63, %v2425_v33  ;;  %v932_v1 = vpop.f32.mrb[17].mxu1 }
 0x398   :  { %v933_v2 = vadd.f32 %v932_v1, %v2421_v28 }
 0x39a   :  { %v1921_v3 = vpop.f32.mrb[18].mxu1 }
 0x39b   :  { %v948_v4 = vadd.f32 %v1921_v3, %v2423_v30  ;;  %v942_v5 = vpop.f32.mrb[19].mxu1 }
 0x39c   :  { %v943_v6 = vadd.f32 %v2419_v22, %v942_v5 }
 0x3b6   :  { %v1932_v7 = vpop.f32.mrb[20].mxu1 }
 0x3b7   :  { %v1037_v9 = vadd.f32 %v1932_v7, %v938_v0  ;;  %v1017_v10 = vpop.f32.mrb[21].mxu1 }
 0x3b8   :  { %v1036_v11 = vadd.f32 %v1017_v10, %v933_v2 }
 0x3b9   :  { %v2531_v12 = vadd.f32 %v1651_v8, %v1037_v9 }
 0x3ba   :  { %v2533_v13 = vadd.f32 %v1651_v8, %v1036_v11  ;;  %v1935_v15 = vpop.f32.mrb[22].mxu1 }
 0x3bb   :  { %v1039_v16 = vadd.f32 %v1935_v15, %v948_v4  ;;  %v1027_v17 = vpop.f32.mrb[23].mxu1  ;;  %v1125_v21 = vmul.f32 %v2531_v12, %v2531_v12 }
 0x3bc   :  { %v2071_v18 = vpack.c.bf16 %v2531_v12, %v2533_v13  ;;  %v1038_v19 = vadd.f32 %v1027_v17, %v943_v6  ;;  %v1124_v22 = vmul.f32 %v2533_v13, %v2533_v13 }
 0x3bd   :  { %v2537_v14 = vadd.f32 %v1651_v8, %v1039_v16 }
 0x3be   :  { %v2539_v20 = vadd.f32 %v1651_v8, %v1038_v19  ;;  %2072 = vmatpush3.bf16.msra.mxu1 %v2071_v18  ;;  %v2077_v30 = vpack.c.bf16 %v1125_v21, %v1124_v22 }
 0x3bf   :  { %2073 = vmatprep.subr.bf16.mxu1 %v2174_v23  ;;  %v1127_v28 = vmul.f32 %v2537_v14, %v2537_v14 }
 0x3c0   :  { %v2074_v26 = vpack.c.bf16 %v2537_v14, %v2539_v20  ;;  %v1126_v29 = vmul.f32 %v2539_v20, %v2539_v20 }
 0x3c2   :  { %2075 = vmatpush3.bf16.msra.mxu1 %v2074_v26  ;;  %v2080_v32 = vpack.c.bf16 %v1127_v28, %v1126_v29 }
 0x3c3   :  { %2076 = vmatprep.subr.bf16.mxu1 %v2174_v23 }
 0x3c5   :  { %1945 = vmatmul.mubr.msk.f32.vlgmr.msra.gmra.mrb[24].mxu1 %vm313_vm1, %v2177_v31 }
 0x3c6   :  { %2078 = vmatpush3.bf16.msra.mxu1 %v2077_v30  ;;  %1955 = vmatprep.mubr.msk.f32.mxu1 %vm2175_vm2, %v2176_v24 }
 0x3c7   :  { %2079 = vmatprep.subr.bf16.mxu1 %v2174_v23 }
 0x3ca   :  { %2081 = vmatpush3.bf16.msra.mxu1 %v2080_v32 }
 0x3cb   :  { %2106 = vmatprep.subr.bf16.mxu1 %v2174_v23 }
 0x3cd   :  { %1956 = vmatmul.mubr.msk.f32.vlgmr.msra.gmra.mrb[26].mxu1 %vm313_vm1, %v2177_v31 }
 0x3ce   :  { %2108 = vmatpush3.bf16.msra.mxu1 %v2456_v35  ;;  %2025 = vmatprep.mubr.msk.f32.mxu1 %vm2175_vm2, %v2176_v24 }
 0x3cf   :  { %2109 = vmatprep.subr.bf16.mxu1 %v2174_v23 }
 0x3d2   :  { %2111 = vmatpush3.bf16.msra.mxu1 %v2462_v44 }
 0x3d3   :  { %2112 = vmatprep.subr.bf16.mxu1 %v2174_v23 }
 0x3d6   :  { %2114 = vmatpush3.bf16.msra.mxu1 %v2472_v47 }
 0x3d7   :  { %2115 = vmatprep.subr.bf16.mxu1 %v2174_v23 }
 0x3da   :  { %2117 = vmatpush3.bf16.msra.mxu1 %v2482_v50  ;;  %v1515_v50 = vshrl.u32 %v1514_v49, 7 }
 0x3db   :  { %2118 = vmatprep.subr.bf16.mxu1 %v2174_v23 }
 0x3dc   :  { %v1516_v51 = vsub.s32 0, %v1515_v50 }
 0x3de   :  { %2120 = vmatpush3.bf16.msra.mxu1 %v2492_v53 }
 0x3df   :  { %2121 = vmatprep.subr.bf16.mxu1 %v2174_v23 }
 0x3e2   :  { %2123 = vmatpush3.bf16.msra.mxu1 %v2502_v56 }
 0x3e3   :  { %2124 = vmatprep.subr.bf16.mxu1 %v2174_v23 }
 0x3e6   :  { %2126 = vmatpush3.bf16.msra.mxu1 %v2512_v59 }
 0x3e7   :  { %2127 = vmatprep.subr.bf16.mxu1 %v2174_v23 }
 0x3ea   :  { %2129 = vmatpush3.bf16.msra.mxu1 %v2104_v62 }
 0x3eb   :  { %2033 = vmatprep.subr.mxu1 %v2176_v24 }
 0x498   :  { %v1120_v33 = vpop.f32.mrb[24].mxu1 }
 0x499   :  { %v1946_v37 = vpop.f32.mrb[25].mxu1  ;;  %1991 = vmatmul.mubr.f32.vlgmr.msra.gmra.mrb[16].mxu0 %v1120_v33 }
 0x49a   :  { %2030 = vmatprep.mubr.msk.f32.mxu0 %vm2175_vm2, %v2176_v24  ;;  %2029 = vmatpush3.msra.mxu0 %v1366_v40 }
 0x4a0   :  { %v1194_v38 = vpop.f32.mrb[26].mxu1 }
 0x4a1   :  { %v1957_v39 = vpop.f32.mrb[27].mxu1  ;;  %2026 = vmatmul.mubr.f32.vlgmr.msra.gmra.mrb[28].mxu1 %v1194_v38 }
 0x4a2   :  { %2035 = vmatprep.mubr.msk.f32.mxu1 %vm2175_vm2, %v2176_v24  ;;  %2034 = vmatpush3.msra.mxu1 %v1366_v40  ;;  %v1359_v24 = vld [vmem:[%s2614_s7] sm:$0x1] }
 0x56c   :  { %v1280_v41 = vpop.f32.mrb[16].mxu0 }
 0x56d   :  { %v1992_v42 = vpop.f32.mrb[17].mxu0  ;;  %v1355_v43 = vmul.f32 0.001953125, %v1280_v41 }
 0x56f   :  { %v1357_v25 = vmul.f32 %v1355_v43, %v1355_v43 }
 0x574   :  { %v1350_v23 = vpop.f32.mrb[28].mxu1 }
 0x575   :  { %v1356_v27 = vmul.f32 0.001953125, %v1350_v23  ;;  %v2027_v34 = vpop.f32.mrb[29].mxu1 }
 0x577   :  { %v1358_v35 = vsub.f32 %v1356_v27, %v1357_v25 }
 0x579   :  { %v1360_v36 = vadd.f32 1e-05, %v1358_v35 }
 0x57b   :  { %2172 = vrsqrt.f32 %v1360_v36 }
 0x585   :  { %v2173_v44 = vpop.eup %2172 }
 0x586   :  { %v1362_v45 = vmul.f32 %v2173_v44, %v1359_v24 }
 0x588   :  { %2031 = vmatmul.mubr.msk.f32.vlgmr.msra.gmra.mrb[18].mxu0 %vm1367_vm3, %v1362_v45  ;;  %v1364_v47 = vmul.f32 %v1362_v45, %v1355_v43 }
 0x58a   :  { %v1365_v48 = vsub.f32 %v1363_v46, %v1364_v47 }
 0x58c   :  { %2036 = vmatmul.mubr.msk.f32.vlgmr.msra.gmra.mrb[30].mxu1 %vm1367_vm3, %v1365_v48 }
 0x65b   :  { %v1437_v52 = vpop.f32.mrb[18].mxu0 }
 0x65c   :  { %v1517_v53 = vrot.slane %v1437_v52, %v1516_v51  ;;  %v2032_v54 = vpop.f32.mrb[19].mxu0 }
 0x65e   :  { %v1518_v55 = vmul.f32 %v1517_v53, %v2533_v13  ;;  %v1519_v57 = vmul.f32 %v1517_v53, %v2531_v12  ;;  %v1520_v58 = vmul.f32 %v1517_v53, %v2539_v20  ;;  %v1521_v59 = vmul.f32 %v1517_v53, %v2537_v14 }
 0x65f   :  { %v1510_v56 = vpop.f32.mrb[30].mxu1 }
 0x660   :  { %v1525_v60 = vrot.slane %v1510_v56, %v1516_v51  ;;  %v2037_v61 = vpop.f32.mrb[31].mxu1 }
 0x662   :  { %v1526_v62 = vadd.f32 %v1525_v60, %v1518_v55  ;;  %v1527_v63 = vadd.f32 %v1525_v60, %v1519_v57  ;;  %v1528_v0 = vadd.f32 %v1525_v60, %v1520_v58  ;;  %v1529_v1 = vadd.f32 %v1525_v60, %v1521_v59 }
 0x664   :  { %v1530_v2 = vmax.f32 %v1526_v62, 0.0  ;;  %v1531_v3 = vmax.f32 %v1527_v63, 0.0  ;;  %v1532_v4 = vmax.f32 %v1528_v0, 0.0  ;;  %v1533_v5 = vmax.f32 %v1529_v1, 0.0 }
 0x666   :  { %1534 = vst [vmem:[%s2616_s11] sm:$0xff] %v1530_v2  ;;  %1535 = vst [vmem:[%s2616_s11 + $0x8] sm:$0xff] %v1531_v3 }
 0x667   :  { %1536 = vst [vmem:[%s2616_s11 + $0x10] sm:$0xff] %v1532_v4  ;;  %1537 = vst [vmem:[%s2616_s11 + $0x18] sm:$0xff] %v1533_v5 }

</bundles_post_ra>
